<compile_context>
chip_gen: v6e
topology: v6e:2x2x1
jax: 0.10.0
libtpu: 0.0.40
codegen_flags: <defaults>
</compile_context>

<pallas_src>
import functools

import jax
import jax.numpy as jnp
from jax import lax
from jax.experimental import pallas as pl
from jax.experimental.pallas import tpu as pltpu

_LANE = 128
_MAX_LANE_CHUNKS = 64   # caps the static unroll of the in-kernel lane loop


def _round_up(x, m):
    return -(-x // m) * m


def _sublane_multiple(itemsize):
    # f32 -> 8 sublanes, bf16/f16 -> 16, int8/fp8 -> 32
    return max(8, 32 // itemsize)


def _vmem_budgets():
    """Return (x-tile byte budget, vmem_limit_bytes), generation aware."""
    try:
        cap = pltpu.get_tpu_info().vmem_capacity_bytes
    except Exception:
        cap = None
    if cap is None or cap <= 96 * 1024 * 1024:      # v7x: 64 MiB per TensorCore
        return 24 * 1024 * 1024, 40 * 1024 * 1024
    return 40 * 1024 * 1024, 50 * 1024 * 1024        # v5e / v6e: 128 MiB


def _choose_tiles(batch, d, itemsize, x_budget):
    """Pick (tb, tk): tk a multiple of 128, tb a multiple of the dtype sublane
    tile, with 2 * tb * tk * itemsize (double-buffered x tiles) <= x_budget."""
    sub = _sublane_multiple(itemsize)
    b_sub = _round_up(batch, sub)
    d128 = _round_up(d, _LANE)

    tk_full = min(d128, _LANE * _MAX_LANE_CHUNKS)
    rows_full = (x_budget // (2 * tk_full * itemsize)) // sub * sub
    if rows_full >= min(b_sub, 256):
        tk = tk_full
        tb = min(1024, b_sub, rows_full)
    else:
        # Defensive path (very large D chunk per step): keep a healthy batch
        # tile and shrink the D chunk instead.
        tb = min(256, b_sub)
        tk = (x_budget // (2 * tb * itemsize)) // _LANE * _LANE
        tk = max(_LANE, min(tk, d128, _LANE * _MAX_LANE_CHUNKS))
    tb = max(sub, tb)

    # Give the "parallel" batch axis at least two blocks so v7x's two
    # TensorCores both get work (one extra ~0.35us grid step on v5e/v6e).
    if batch > 2 * sub and -(-batch // tb) == 1:
        tb = _round_up(-(-batch // 2), sub)
    return tb, tk


def _critic_head_kernel(x_ref, w_ref, b_ref, o_ref, acc_ref, *, d, tk, n_chunks):
    # x_ref: (tb, tk) native dtype block (possibly ragged at the B / D tails)
    # w_ref: (1, tk) f32 block (possibly ragged at the D tail)
    # b_ref: (1,) f32 in SMEM
    # o_ref: (tb, 1) f32 block
    # acc_ref: (tb, 128) f32 scratch, persistent across the K grid axis
    k = pl.program_id(1)

    @pl.when(k == 0)
    def _init():
        acc_ref[...] = jnp.zeros_like(acc_ref)

    # Number of valid columns in the final (possibly ragged) K block (static).
    n_k_static = -(-d // tk)
    rem_last = d - (n_k_static - 1) * tk

    needs_mask = any(c * _LANE + _LANE > rem_last for c in range(n_chunks))
    if needs_mask:
        lane = lax.broadcasted_iota(jnp.int32, acc_ref.shape, 1)   # (tb, 128)
        col_base = k * tk + lane

    # Per-step work is pure VPU: 128-lane-group multiply-adds into the f32
    # accumulator.  No full-tile f32 product and no per-step cross-lane reduce.
    partial = acc_ref[...]
    for c in range(n_chunks):
        start = c * _LANE
        xc = x_ref[:, start:start + _LANE].astype(jnp.float32)
        wc = w_ref[:, start:start + _LANE]
        pc = xc * wc
        if start + _LANE > rem_last:
            # Only chunks that can overlap the ragged D tail pay for a select;
            # masking the product keeps garbage (even NaN/Inf) out of the sum.
            pc = jnp.where(col_base + start < d, pc, 0.0)
        partial = partial + pc
    acc_ref[...] = partial

    @pl.when(k == pl.num_programs(1) - 1)
    def _finalize():
        # Single XLU cross-lane reduce per batch tile, bias add, cast, store.
        total = jnp.sum(acc_ref[...], axis=-1, keepdims=True) + b_ref[0]
        o_ref[...] = total.astype(o_ref.dtype)


@jax.jit
def critic_head_forward(x, weight, bias):
    """x: (B, D); weight: (1, D) (PyTorch nn.Linear layout); bias: (1,).

    Returns (B, 1) float32, matching CriticHead.forward(x) = fc(x).
    """
    B, D = x.shape
    itemsize = jnp.dtype(x.dtype).itemsize
    x_budget, vmem_limit = _vmem_budgets()
    tb, tk = _choose_tiles(B, D, itemsize, x_budget)

    grid = (pl.cdiv(B, tb), pl.cdiv(D, tk))
    n_chunks = tk // _LANE

    w = weight.astype(jnp.float32)           # tiny (1, D); cast is negligible
    b = bias.reshape(1).astype(jnp.float32)  # SMEM scalar

    kernel = functools.partial(_critic_head_kernel, d=D, tk=tk, n_chunks=n_chunks)

    cost = pl.CostEstimate(
        flops=2 * B * D,
        transcendentals=0,
        bytes_accessed=B * D * itemsize + D * 4 + B * 4 + 4,
    )

    out = pl.pallas_call(
        kernel,
        out_shape=jax.ShapeDtypeStruct((B, 1), jnp.float32),
        grid_spec=pltpu.PrefetchScalarGridSpec(
            num_scalar_prefetch=0,
            grid=grid,
            in_specs=[
                pl.BlockSpec((tb, tk), lambda i, k: (i, k)),        # x tiles
                pl.BlockSpec((1, tk), lambda i, k: (0, k)),         # weight chunk
                pl.BlockSpec(memory_space=pltpu.MemorySpace.SMEM),  # bias scalar
            ],
            out_specs=pl.BlockSpec((tb, 1), lambda i, k: (i, 0)),
            scratch_shapes=[pltpu.VMEM((tb, _LANE), jnp.float32)],
        ),
        compiler_params=pltpu.CompilerParams(
            dimension_semantics=("parallel", "arbitrary"),
            vmem_limit_bytes=vmem_limit,
        ),
        cost_estimate=cost,
    )(x, w, b)

    return out  # (B, 1) float32


def _orthogonal_row(key, n):
    """Orthogonal init for a (1, n) matrix == a unit-norm random row."""
    v = jax.random.normal(key, (1, n), dtype=jnp.float32)
    return v / jnp.linalg.norm(v)


if __name__ == "__main__":
    input_size = 32
    batch = 2

    key = jax.random.PRNGKey(0)
    k_w, k_x = jax.random.split(key)

    # Deterministic parameter init mirroring the module's __init__:
    #   nn.init.orthogonal_(fc.weight) -> unit-norm row for a (1, D) weight
    #   nn.init.constant_(fc.bias, 0)
    weight = _orthogonal_row(k_w, input_size)   # (1, D)
    bias = jnp.zeros((1,), dtype=jnp.float32)   # (1,)

    x = jax.random.normal(k_x, (batch, input_size), dtype=jnp.float32)

    out = critic_head_forward(x, weight, bias)
    jax.block_until_ready(out)

    # Reference check in plain JAX (same semantics as fc(x)).
    ref = x @ weight.T + bias
    assert out.shape == (batch, 1)
    assert jnp.allclose(out, ref, atol=1e-5, rtol=1e-5)

    print("KERNEL_OK")
</pallas_src>

<mosaic_0001>
module attributes {stable_mosaic.version = 11 : i64} {
  func.func @_critic_head_kernel(%arg0: i32, %arg1: i32, %arg2: memref<8x128xf32, #tpu.memory_space<vmem>>, %arg3: memref<1x128xf32, #tpu.memory_space<vmem>>, %arg4: memref<1xf32, #tpu.memory_space<smem>>, %arg5: memref<8x1xf32, #tpu.memory_space<vmem>>, %arg6: memref<8x128xf32, #tpu.memory_space<vmem>>) attributes {dimension_semantics = [#tpu.dimension_semantics<parallel>, #tpu.dimension_semantics<arbitrary>], iteration_bounds = array<i64: 1, 1>, scalar_prefetch = 0 : i64, scratch_operands = 1 : i64, tpu.core_type = #tpu.core_type<tc>, window_params = [{transform_indices = @transform_0, window_bounds = array<i64: 8, 128>}, {transform_indices = @transform_1, window_bounds = array<i64: 1, 128>}, {transform_indices = @transform_2, window_bounds = array<i64: 1>}, {transform_indices = @transform_3, window_bounds = array<i64: 8, 1>}]} {
    %c0_i32 = arith.constant 0 : i32
    %0 = arith.cmpi eq, %arg1, %c0_i32 : i32
    %1 = arith.extui %0 : i1 to i32
    %c0_i32_0 = arith.constant 0 : i32
    %2 = arith.cmpi ne, %1, %c0_i32_0 : i32
    scf.if %2 {
      %cst_11 = arith.constant 0.000000e+00 : f32
      %23 = vector.broadcast %cst_11 : f32 to vector<8x128xf32>
      %c0_12 = arith.constant 0 : index
      %c0_13 = arith.constant 0 : index
      %24 = vector.load %arg6[%c0_12, %c0_13] : memref<8x128xf32, #tpu.memory_space<vmem>>, vector<8x128xf32>
      tpu.vector_store %arg6[%c0_12, %c0_13], %23 {strides = array<i32>} : memref<8x128xf32, #tpu.memory_space<vmem>>, vector<8x128xf32>,
    } else {
    }
    %3 = tpu.iota {dimensions = array<i32: 1>} : vector<8x128xi32>
    %c128_i32 = arith.constant 128 : i32
    %4 = arith.muli %arg1, %c128_i32 : i32
    %5 = vector.broadcast %4 : i32 to vector<8x128xi32>
    %6 = arith.addi %5, %3 : vector<8x128xi32>
    %c0 = arith.constant 0 : index
    %c0_1 = arith.constant 0 : index
    %7 = vector.load %arg6[%c0, %c0_1] : memref<8x128xf32, #tpu.memory_space<vmem>>, vector<8x128xf32>
    %c0_2 = arith.constant 0 : index
    %c0_3 = arith.constant 0 : index
    %8 = vector.load %arg2[%c0_2, %c0_3] : memref<8x128xf32, #tpu.memory_space<vmem>>, vector<8x128xf32>
    %c0_4 = arith.constant 0 : index
    %c0_5 = arith.constant 0 : index
    %9 = vector.load %arg3[%c0_4, %c0_5] : memref<1x128xf32, #tpu.memory_space<vmem>>, vector<1x128xf32>
    %10 = vector.broadcast %9 : vector<1x128xf32> to vector<8x128xf32>
    %11 = arith.mulf %8, %10 : vector<8x128xf32>
    %c0_i32_6 = arith.constant 0 : i32
    %12 = vector.broadcast %c0_i32_6 : i32 to vector<8x128xi32>
    %13 = arith.addi %6, %12 : vector<8x128xi32>
    %c32_i32 = arith.constant 32 : i32
    %14 = vector.broadcast %c32_i32 : i32 to vector<8x128xi32>
    %15 = arith.cmpi slt, %13, %14 : vector<8x128xi32>
    %cst = arith.constant 0.000000e+00 : f32
    %16 = vector.broadcast %cst : f32 to vector<8x128xf32>
    %17 = arith.select %15, %11, %16 : vector<8x128xi1>, vector<8x128xf32>
    %18 = arith.addf %7, %17 : vector<8x128xf32>
    %c0_7 = arith.constant 0 : index
    %c0_8 = arith.constant 0 : index
    %19 = vector.load %arg6[%c0_7, %c0_8] : memref<8x128xf32, #tpu.memory_space<vmem>>, vector<8x128xf32>
    tpu.vector_store %arg6[%c0_7, %c0_8], %18 {strides = array<i32>} : memref<8x128xf32, #tpu.memory_space<vmem>>, vector<8x128xf32>,
    %c0_i32_9 = arith.constant 0 : i32
    %20 = arith.cmpi eq, %arg1, %c0_i32_9 : i32
    %21 = arith.extui %20 : i1 to i32
    %c0_i32_10 = arith.constant 0 : i32
    %22 = arith.cmpi ne, %21, %c0_i32_10 : i32
    scf.if %22 {
      %c0_11 = arith.constant 0 : index
      %c0_12 = arith.constant 0 : index
      %23 = vector.load %arg6[%c0_11, %c0_12] : memref<8x128xf32, #tpu.memory_space<vmem>>, vector<8x128xf32>
      %cst_13 = arith.constant dense<0.000000e+00> : vector<8xf32>
      %24 = vector.multi_reduction <add>, %23, %cst_13 [1] : vector<8x128xf32> to vector<8xf32>
      %25 = vector.shape_cast %24 : vector<8xf32> to vector<8x1xf32>
      %c0_14 = arith.constant 0 : index
      %26 = memref.load %arg4[%c0_14] : memref<1xf32, #tpu.memory_space<smem>>
      %27 = vector.broadcast %26 : f32 to vector<8x1xf32>
      %28 = arith.addf %25, %27 : vector<8x1xf32>
      %c0_15 = arith.constant 0 : index
      %c0_16 = arith.constant 0 : index
      %29 = vector.load %arg5[%c0_15, %c0_16] : memref<8x1xf32, #tpu.memory_space<vmem>>, vector<8x1xf32>
      tpu.vector_store %arg5[%c0_15, %c0_16], %28 {strides = array<i32>} : memref<8x1xf32, #tpu.memory_space<vmem>>, vector<8x1xf32>,
    } else {
    }
    return
  }
  func.func @transform_0(%arg0: i32, %arg1: i32) -> (i32, i32) {
    %c0_i32 = arith.constant 0 : i32
    return %arg0, %arg1 : i32, i32
  }
  func.func @transform_1(%arg0: i32, %arg1: i32) -> (i32, i32) {
    %c0_i32 = arith.constant 0 : i32
    %c0_i32_0 = arith.constant 0 : i32
    return %c0_i32, %arg1 : i32, i32
  }
  func.func @transform_2(%arg0: i32, %arg1: i32) -> i32 {
    %c0_i32 = arith.constant 0 : i32
    %c0_i32_0 = arith.constant 0 : i32
    return %c0_i32 : i32
  }
  func.func @transform_3(%arg0: i32, %arg1: i32) -> (i32, i32) {
    %c0_i32 = arith.constant 0 : i32
    %c0_i32_0 = arith.constant 0 : i32
    return %arg0, %c0_i32 : i32, i32
  }
}

</mosaic_0001>

<bundles_post_ra>
// kernel: critic_head_forward.1
= control target key start
LH: loop header
LB: loop body
LE: loop exit
PB: predicated region body
PF: predicated region fallthrough
CT: control target
= control target key end

     0   :  { %v20_v0 = vlaneseq  ;;  %vm48_vm1 = vcmask 7168   ;;  %s124_s0 = inlined_call_operand.vmem [shape: f32[2,32], index: 0, kind: input, shape index: {}]   ;;  %s125_s1 = inlined_call_operand.vmem [shape: f32[1,32], index: 1, kind: input, shape index: {}]   ;;  %s126_s2 = inlined_call_operand.<no memory space> [shape: f32[1], index: 2, kind: input, shape index: {}]   ;;  %s127_s3 = inlined_call_operand.vmem [shape: f32[2,1], index: 3, kind: output, shape index: {}]  }
   0x1   :  { %v26_v1 = vld [vmem:[%s124_s0] sm:$0xff]  ;;  %v46_v6 = vstv %s126_s2 }
   0x2   :  { %v91_v2 = vld [vmem:[%s125_s1] ss:$0 sm:$0xff]  ;;  %v21_v4 = vand.u32 127, %v20_v0 }
   0x3   :  { %v34_v3 = vmul.f32 %v91_v2, %v26_v1 }
   0x4   :  { %vm35_vm0 = vcmp.lt.s32.totalorder %v21_v4, 32 }
   0x5   :  { %v36_v5 = vsel %vm35_vm0, %v34_v3, 0.0 }
   0x6   :  { %43 = vadd.xlane.f32.xlu0 %v36_v5 }
  0x8f   :  { %v44_v7 = vpop.xlane.xlu0 %43 }
  0x90   :  { %v47_v8 = vadd.f32 %v46_v6, %v44_v7 }
  0x92   :  { %49 = vst.msk [vmem:[#allocation4] sm:$0xff] %vm48_vm1, %v47_v8 }
  0x99   :  { %v68_v9 = vld [vmem:[#allocation4] sm:$0x3] }
  0x9a   :  { %69 = vst [vmem:[%s127_s3] sm:$0x3] %v68_v9 }

</bundles_post_ra>
